<compile_context>
chip_gen: v5e
topology: v5e:2x2
jax: 0.10.0
libtpu: 0.0.40
codegen_flags: <defaults>
</compile_context>

<pallas_src>
import functools

import jax
import jax.numpy as jnp
from jax.experimental import pallas as pl
from jax.experimental.pallas import tpu as pltpu

_LANE = 128      # lane width (last-dim alignment)
_SUBLANE = 8     # sublane width (second-to-last-dim alignment)


def _round_up(n, m):
    return ((n + m - 1) // m) * m


def _fused_encoder_kernel(num_layers, *refs):
    """refs = (x_ref, w1_ref, b1_ref, ..., wL_ref, bL_ref, o_ref).

    All refs are full-array VMEM blocks (feature dims padded to 128).
    Computes h = relu(h @ W_i + b_i) for each layer, entirely on-chip.
    """
    x_ref = refs[0]
    o_ref = refs[-1]
    wb_refs = refs[1:-1]

    h = x_ref[...]
    for i in range(num_layers):
        w = wb_refs[2 * i][...]        # [Din_pad, Dout_pad]
        b = wb_refs[2 * i + 1][...]    # [1, Dout_pad]
        acc = jnp.dot(h, w, preferred_element_type=jnp.float32)   # MXU
        h = jnp.maximum(acc + b, 0.0)                             # VPU, f32
    o_ref[...] = h.astype(o_ref.dtype)


def encoder_forward(x, params):
    """Forward pass of the whole encoder as ONE fused Pallas kernel.

    x:      [B, input_dim]
    params: list of (w, b) with w: [n_in, n_out], b: [n_out]
    returns [B, n_neurons[-1]]
    """
    B, Din = x.shape
    num_layers = len(params)

    # Pad batch to sublane multiple, features to lane multiple (128).
    B_pad = _round_up(B, _SUBLANE)
    Din_pad = _round_up(Din, _LANE)
    x_pad = jnp.zeros((B_pad, Din_pad), x.dtype).at[:B, :Din].set(x)

    padded_wb = []
    in_dim, in_pad = Din, Din_pad
    for (w, b) in params:
        din_w, dout = w.shape
        assert din_w == in_dim, (din_w, in_dim)
        dout_pad = _round_up(dout, _LANE)
        # Zero padding keeps math exact: padded input cols hit zero weight rows,
        # padded output cols get relu(0 + 0) = 0 and feed zero rows next layer.
        w_pad = jnp.zeros((in_pad, dout_pad), w.dtype).at[:in_dim, :dout].set(w)
        b_pad = jnp.zeros((1, dout_pad), b.dtype).at[0, :dout].set(b)
        padded_wb += [w_pad, b_pad]
        in_dim, in_pad = dout, dout_pad

    dout_last = params[-1][0].shape[1]
    dout_last_pad = in_pad

    vmem_spec = pl.BlockSpec(memory_space=pltpu.MemorySpace.VMEM)
    kernel = functools.partial(_fused_encoder_kernel, num_layers)

    out_pad = pl.pallas_call(
        kernel,
        out_shape=jax.ShapeDtypeStruct((B_pad, dout_last_pad), x.dtype),
        in_specs=[vmem_spec] * (1 + 2 * num_layers),
        out_specs=vmem_spec,
    )(x_pad, *padded_wb)

    # TODO(synk): for batch >= 256 on v7x, add a "parallel" batch grid so both
    # TensorCores split the rows (weights stay resident via index_map (0, 0)).
    return out_pad[:B, :dout_last]


def init_encoder_params(key, input_dim, n_neurons, dtype=jnp.float32):
    """Deterministic parameter init matching nn.Linear shapes.

    PyTorch nn.Linear(n_in, n_out) has weight [n_out, n_in], bias [n_out].
    We store the weight transposed as [n_in, n_out] for the x @ W layout.
    Init mimics PyTorch's uniform(-1/sqrt(n_in), 1/sqrt(n_in)).
    """
    params = []
    n_in = input_dim
    for n_out in n_neurons:
        kw, kb, key = jax.random.split(key, 3)
        bound = 1.0 / jnp.sqrt(jnp.float32(n_in))
        w = jax.random.uniform(kw, (n_in, n_out), dtype, -bound, bound)
        b = jax.random.uniform(kb, (n_out,), dtype, -bound, bound)
        params.append((w, b))
        n_in = n_out
    return params


def encoder_forward_ref(x, params):
    """Pure-JAX reference for correctness checking."""
    h = x
    for (w, b) in params:
        h = jnp.maximum(h @ w + b, 0.0)
    return h


if __name__ == "__main__":
    key = jax.random.PRNGKey(0)
    kx, kp = jax.random.split(key)

    batch = 8
    input_dim = 32
    n_neurons = [64, 32, 16]   # Encoder(input_dim=32, n_neurons=[64, 32, 16])

    x = jax.random.normal(kx, (batch, input_dim), dtype=jnp.float32)
    params = init_encoder_params(kp, input_dim, n_neurons)

    fwd = jax.jit(encoder_forward)
    out = fwd(x, params)
    out = jax.block_until_ready(out)

    ref = encoder_forward_ref(x, params)
    assert out.shape == (batch, n_neurons[-1]), out.shape
    assert jnp.allclose(out, ref, atol=1e-5, rtol=1e-5), "mismatch vs reference"

    print("KERNEL_OK")
</pallas_src>

<mosaic_0001>
module attributes {stable_mosaic.version = 11 : i64} {
  func.func @_fused_encoder_kernel(%arg0: memref<8x128xf32, #tpu.memory_space<vmem>>, %arg1: memref<128x128xf32, #tpu.memory_space<vmem>>, %arg2: memref<1x128xf32, #tpu.memory_space<vmem>>, %arg3: memref<128x128xf32, #tpu.memory_space<vmem>>, %arg4: memref<1x128xf32, #tpu.memory_space<vmem>>, %arg5: memref<128x128xf32, #tpu.memory_space<vmem>>, %arg6: memref<1x128xf32, #tpu.memory_space<vmem>>, %arg7: memref<8x128xf32, #tpu.memory_space<vmem>>) attributes {dimension_semantics = [], scalar_prefetch = 0 : i64, scratch_operands = 0 : i64, tpu.core_type = #tpu.core_type<tc>} {
    %c0 = arith.constant 0 : index
    %c0_0 = arith.constant 0 : index
    %0 = vector.load %arg0[%c0, %c0_0] : memref<8x128xf32, #tpu.memory_space<vmem>>, vector<8x128xf32>
    %c0_1 = arith.constant 0 : index
    %c0_2 = arith.constant 0 : index
    %1 = vector.load %arg1[%c0_1, %c0_2] : memref<128x128xf32, #tpu.memory_space<vmem>>, vector<128x128xf32>
    %c0_3 = arith.constant 0 : index
    %c0_4 = arith.constant 0 : index
    %2 = vector.load %arg2[%c0_3, %c0_4] : memref<1x128xf32, #tpu.memory_space<vmem>>, vector<1x128xf32>
    %cst = arith.constant dense<0.000000e+00> : vector<8x128xf32>
    %3 = tpu.matmul %0, %1, %cst {dimension_numbers = #tpu.dot_dimension_numbers<[1], [0], [0], [1], [0, 0, 1, 1], [], []>} : vector<8x128xf32>, vector<128x128xf32>, vector<8x128xf32> -> vector<8x128xf32>
    %4 = vector.broadcast %2 : vector<1x128xf32> to vector<8x128xf32>
    %5 = arith.addf %3, %4 : vector<8x128xf32>
    %cst_5 = arith.constant 0.000000e+00 : f32
    %6 = vector.broadcast %cst_5 : f32 to vector<8x128xf32>
    %7 = arith.maximumf %5, %6 : vector<8x128xf32>
    %c0_6 = arith.constant 0 : index
    %c0_7 = arith.constant 0 : index
    %8 = vector.load %arg3[%c0_6, %c0_7] : memref<128x128xf32, #tpu.memory_space<vmem>>, vector<128x128xf32>
    %c0_8 = arith.constant 0 : index
    %c0_9 = arith.constant 0 : index
    %9 = vector.load %arg4[%c0_8, %c0_9] : memref<1x128xf32, #tpu.memory_space<vmem>>, vector<1x128xf32>
    %cst_10 = arith.constant dense<0.000000e+00> : vector<8x128xf32>
    %10 = tpu.matmul %7, %8, %cst_10 {dimension_numbers = #tpu.dot_dimension_numbers<[1], [0], [0], [1], [0, 0, 1, 1], [], []>} : vector<8x128xf32>, vector<128x128xf32>, vector<8x128xf32> -> vector<8x128xf32>
    %11 = vector.broadcast %9 : vector<1x128xf32> to vector<8x128xf32>
    %12 = arith.addf %10, %11 : vector<8x128xf32>
    %cst_11 = arith.constant 0.000000e+00 : f32
    %13 = vector.broadcast %cst_11 : f32 to vector<8x128xf32>
    %14 = arith.maximumf %12, %13 : vector<8x128xf32>
    %c0_12 = arith.constant 0 : index
    %c0_13 = arith.constant 0 : index
    %15 = vector.load %arg5[%c0_12, %c0_13] : memref<128x128xf32, #tpu.memory_space<vmem>>, vector<128x128xf32>
    %c0_14 = arith.constant 0 : index
    %c0_15 = arith.constant 0 : index
    %16 = vector.load %arg6[%c0_14, %c0_15] : memref<1x128xf32, #tpu.memory_space<vmem>>, vector<1x128xf32>
    %cst_16 = arith.constant dense<0.000000e+00> : vector<8x128xf32>
    %17 = tpu.matmul %14, %15, %cst_16 {dimension_numbers = #tpu.dot_dimension_numbers<[1], [0], [0], [1], [0, 0, 1, 1], [], []>} : vector<8x128xf32>, vector<128x128xf32>, vector<8x128xf32> -> vector<8x128xf32>
    %18 = vector.broadcast %16 : vector<1x128xf32> to vector<8x128xf32>
    %19 = arith.addf %17, %18 : vector<8x128xf32>
    %cst_17 = arith.constant 0.000000e+00 : f32
    %20 = vector.broadcast %cst_17 : f32 to vector<8x128xf32>
    %21 = arith.maximumf %19, %20 : vector<8x128xf32>
    %c0_18 = arith.constant 0 : index
    %c0_19 = arith.constant 0 : index
    %22 = vector.load %arg7[%c0_18, %c0_19] : memref<8x128xf32, #tpu.memory_space<vmem>>, vector<8x128xf32>
    tpu.vector_store %arg7[%c0_18, %c0_19], %21 {strides = array<i32>} : memref<8x128xf32, #tpu.memory_space<vmem>>, vector<8x128xf32>,
    return
  }
}

</mosaic_0001>

<bundles_post_ra>
// kernel: encoder_forward.1
= control target key start
LH: loop header
LB: loop body
LE: loop exit
PB: predicated region body
PF: predicated region fallthrough
CT: control target
= control target key end

     0   :  { %s398_s0 = inlined_call_operand.vmem [shape: f32[8,128], index: 0, kind: input, shape index: {}]   ;;  %s399_s1 = inlined_call_operand.vmem [shape: f32[128,128], index: 1, kind: input, shape index: {}]   ;;  %s400_s2 = inlined_call_operand.vmem [shape: f32[1,128], index: 2, kind: input, shape index: {}]   ;;  %s401_s3 = inlined_call_operand.vmem [shape: f32[128,128], index: 3, kind: input, shape index: {}]   ;;  %s402_s4 = inlined_call_operand.vmem [shape: f32[1,128], index: 4, kind: input, shape index: {}]   ;;  %s403_s5 = inlined_call_operand.vmem [shape: f32[128,128], index: 5, kind: input, shape index: {}]   ;;  %s404_s6 = inlined_call_operand.vmem [shape: f32[1,128], index: 6, kind: input, shape index: {}]   ;;  %s405_s7 = inlined_call_operand.hbm [shape: f32[8,128], index: 7, kind: output, shape index: {}]  }
   0x1   :  { %v43_v0 = vld [vmem:[%s399_s1 + $0x78] sm:$0xff]  ;;  %v42_v1 = vld [vmem:[%s399_s1 + $0x70] sm:$0xff]  ;;  %v41_v2 = vld [vmem:[%s399_s1 + $0x68] sm:$0xff] }
   0x2   :  { %48 = vmatpush.msra.mxu0 %v43_v0  ;;  %v40_v3 = vld [vmem:[%s399_s1 + $0x60] sm:$0xff]  ;;  %v84_v4 = vld [vmem:[%s401_s3 + $0x78] sm:$0xff]  ;;  %v83_v6 = vld [vmem:[%s401_s3 + $0x70] sm:$0xff] }
   0x3   :  { %v39_v5 = vld [vmem:[%s399_s1 + $0x58] sm:$0xff]  ;;  %89 = vmatpush.msra.mxu1 %v84_v4  ;;  %v82_v7 = vld [vmem:[%s401_s3 + $0x68] sm:$0xff]  ;;  %v38_v8 = vld [vmem:[%s399_s1 + $0x50] sm:$0xff] }
   0x4   :  { %49 = vmatpush.msra.mxu0 %v42_v1  ;;  %v81_v9 = vld [vmem:[%s401_s3 + $0x60] sm:$0xff]  ;;  %v37_v10 = vld [vmem:[%s399_s1 + $0x48] sm:$0xff]  ;;  %v80_v11 = vld [vmem:[%s401_s3 + $0x58] sm:$0xff] }
   0x5   :  { %90 = vmatpush.msra.mxu1 %v83_v6 }
   0x6   :  { %50 = vmatpush.msra.mxu0 %v41_v2 }
   0x7   :  { %91 = vmatpush.msra.mxu1 %v82_v7 }
   0x8   :  { %51 = vmatpush.msra.mxu0 %v40_v3 }
   0xa   :  { %52 = vmatpush.msra.mxu0 %v39_v5 }
   0xc   :  { %53 = vmatpush.msra.mxu0 %v38_v8 }
   0xd   :  { %12 = vsyncpa [#allocation3], 0  ;;  %v36_v12 = vld [vmem:[%s399_s1 + $0x40] sm:$0xff]  ;;  %92 = vmatpush.msra.mxu1 %v81_v9  ;;  %v79_v13 = vld [vmem:[%s401_s3 + $0x50] sm:$0xff]  ;;  %s198_s29 = smov [#allocation2]  }
   0xe   :  { %54 = vmatpush.msra.mxu0 %v37_v10  ;;  %v35_v14 = vld [vmem:[%s399_s1 + $0x38] sm:$0xff]  ;;  %v78_v15 = vld [vmem:[%s401_s3 + $0x48] sm:$0xff]  ;;  %v34_v16 = vld [vmem:[%s399_s1 + $0x30] sm:$0xff]  ;;  %s157_s30 = sshll.u32 %s198_s29, 4  ;;  %s158_s30 = int_to_ptr.vmem [resolvable:$true] %s157_s30 }
   0xf   :  { %93 = vmatpush.msra.mxu1 %v80_v11  ;;  %v77_v17 = vld [vmem:[%s401_s3 + $0x40] sm:$0xff]  ;;  %v33_v18 = vld [vmem:[%s399_s1 + $0x28] sm:$0xff]  ;;  %v76_v19 = vld [vmem:[%s401_s3 + $0x38] sm:$0xff] }
  0x10   :  { %55 = vmatpush.msra.mxu0 %v36_v12  ;;  %v32_v20 = vld [vmem:[%s399_s1 + $0x20] sm:$0xff]  ;;  %v75_v21 = vld [vmem:[%s401_s3 + $0x30] sm:$0xff]  ;;  %v31_v22 = vld [vmem:[%s399_s1 + $0x18] sm:$0xff] }
  0x11   :  { %94 = vmatpush.msra.mxu1 %v79_v13  ;;  %v74_v23 = vld [vmem:[%s401_s3 + $0x28] sm:$0xff]  ;;  %v30_v24 = vld [vmem:[%s399_s1 + $0x10] sm:$0xff]  ;;  %v73_v25 = vld [vmem:[%s401_s3 + $0x20] sm:$0xff] }
  0x12   :  { %56 = vmatpush.msra.mxu0 %v35_v14  ;;  %v29_v26 = vld [vmem:[%s399_s1 + $0x8] sm:$0xff]  ;;  %v72_v27 = vld [vmem:[%s401_s3 + $0x18] sm:$0xff]  ;;  %v28_v28 = vld [vmem:[%s399_s1] sm:$0xff] }
  0x13   :  { %95 = vmatpush.msra.mxu1 %v78_v15  ;;  %v27_v29 = vld [vmem:[%s398_s0] sm:$0xff]  ;;  %v71_v30 = vld [vmem:[%s401_s3 + $0x10] sm:$0xff]  ;;  %v70_v31 = vld [vmem:[%s401_s3 + $0x8] sm:$0xff] }
  0x14   :  { %57 = vmatpush.msra.mxu0 %v34_v16  ;;  %v69_v32 = vld [vmem:[%s401_s3] sm:$0xff]  ;;  %v125_v33 = vld [vmem:[%s403_s5 + $0x78] sm:$0xff]  ;;  %v124_v34 = vld [vmem:[%s403_s5 + $0x70] sm:$0xff] }
  0x15   :  { %96 = vmatpush.msra.mxu1 %v77_v17  ;;  %130 = vmatpush.msra.mxu2 %v125_v33  ;;  %v123_v35 = vld [vmem:[%s403_s5 + $0x68] sm:$0xff]  ;;  %v122_v36 = vld [vmem:[%s403_s5 + $0x60] sm:$0xff]  ;;  %v121_v37 = vld [vmem:[%s403_s5 + $0x58] sm:$0xff] }
  0x16   :  { %58 = vmatpush.msra.mxu0 %v33_v18  ;;  %v120_v38 = vld [vmem:[%s403_s5 + $0x50] sm:$0xff]  ;;  %v119_v39 = vld [vmem:[%s403_s5 + $0x48] sm:$0xff]  ;;  %v118_v40 = vld [vmem:[%s403_s5 + $0x40] sm:$0xff] }
  0x17   :  { %97 = vmatpush.msra.mxu1 %v76_v19  ;;  %131 = vmatpush.msra.mxu2 %v124_v34  ;;  %v117_v41 = vld [vmem:[%s403_s5 + $0x38] sm:$0xff]  ;;  %v116_v42 = vld [vmem:[%s403_s5 + $0x30] sm:$0xff]  ;;  %v115_v43 = vld [vmem:[%s403_s5 + $0x28] sm:$0xff] }
  0x18   :  { %59 = vmatpush.msra.mxu0 %v32_v20  ;;  %v114_v44 = vld [vmem:[%s403_s5 + $0x20] sm:$0xff]  ;;  %v113_v45 = vld [vmem:[%s403_s5 + $0x18] sm:$0xff]  ;;  %v112_v50 = vld [vmem:[%s403_s5 + $0x10] sm:$0xff] }
  0x19   :  { %98 = vmatpush.msra.mxu1 %v75_v21  ;;  %132 = vmatpush.msra.mxu2 %v123_v35  ;;  %v169_v46 = vld [vmem:[%s400_s2] ss:$0 sm:$0xff]  ;;  %v111_v51 = vld [vmem:[%s403_s5 + $0x8] sm:$0xff] }
  0x1a   :  { %60 = vmatpush.msra.mxu0 %v31_v22  ;;  %v110_v52 = vld [vmem:[%s403_s5] sm:$0xff]  ;;  %s159_s5 = sshll.u32 %s405_s7, 4  ;;  %s160_s5 = int_to_ptr.hbm [resolvable:$true] %s159_s5 }
  0x1b   :  { %99 = vmatpush.msra.mxu1 %v74_v23  ;;  %133 = vmatpush.msra.mxu2 %v122_v36  ;;  %v170_v53 = vld [vmem:[%s402_s4] ss:$0 sm:$0xff] }
  0x1c   :  { %61 = vmatpush.msra.mxu0 %v30_v24  ;;  %v171_v57 = vld [vmem:[%s404_s6] ss:$0 sm:$0xff] }
  0x1d   :  { %100 = vmatpush.msra.mxu1 %v73_v25  ;;  %134 = vmatpush.msra.mxu2 %v121_v37 }
  0x1e   :  { %62 = vmatpush.msra.mxu0 %v29_v26 }
  0x1f   :  { %101 = vmatpush.msra.mxu1 %v72_v27  ;;  %135 = vmatpush.msra.mxu2 %v120_v38 }
  0x20   :  { %63 = vmatpush.msra.mxu0 %v28_v28 }
  0x21   :  { %64 = vmatmul.f32.vlgmr.msra.gmra.mxu0 %v27_v29  ;;  %102 = vmatpush.msra.mxu1 %v71_v30 }
  0x22   :  { %136 = vmatpush.msra.mxu2 %v119_v39 }
  0x23   :  { %103 = vmatpush.msra.mxu1 %v70_v31 }
  0x24   :  { %137 = vmatpush.msra.mxu2 %v118_v40 }
  0x25   :  { %104 = vmatpush.msra.mxu1 %v69_v32 }
  0x26   :  { %138 = vmatpush.msra.mxu2 %v117_v41 }
  0x28   :  { %139 = vmatpush.msra.mxu2 %v116_v42 }
  0x2a   :  { %140 = vmatpush.msra.mxu2 %v115_v43 }
  0x2c   :  { %141 = vmatpush.msra.mxu2 %v114_v44 }
  0x2e   :  { %142 = vmatpush.msra.mxu2 %v113_v45 }
  0x30   :  { %143 = vmatpush.msra.mxu2 %v112_v50 }
  0x32   :  { %144 = vmatpush.msra.mxu2 %v111_v51 }
  0x34   :  { %145 = vmatpush.msra.mxu2 %v110_v52 }
  0x9e   :  { %v65_v47 = vpop.f32.mrf.mxu0 }
  0x9f   :  { %v66_v48 = vadd.f32 %v169_v46, %v65_v47 }
  0xa1   :  { %v68_v49 = vmax.f32 %v66_v48, 0.0 }
  0xa3   :  { %105 = vmatmul.f32.vlgmr.msra.gmra.mxu1 %v68_v49 }
 0x120   :  { %v106_v54 = vpop.f32.mrf.mxu1 }
 0x121   :  { %v107_v55 = vadd.f32 %v170_v53, %v106_v54 }
 0x123   :  { %v109_v56 = vmax.f32 %v107_v55, 0.0 }
 0x125   :  { %146 = vmatmul.f32.vlgmr.msra.gmra.mxu2 %v109_v56 }
 0x1a8   :  { %v147_v58 = vpop.f32.mrf.mxu2 }
 0x1a9   :  { %v148_v59 = vadd.f32 %v171_v57, %v147_v58 }
 0x1ab   :  { %v150_v60 = vmax.f32 %v148_v59, 0.0 }
 0x1ad   :  { %151 = vst [vmem:[#allocation2] sm:$0xff] %v150_v60 }
 0x1ae   :  { %162 = dma.vmem_to_hbm [thread:$0]  %s158_s30, 128, %s160_s5, [#allocation3]  }
 0x1af   :  { %196 = dma.done.wait [#allocation3], 128  }
 0x1b0   :  { %197 = vsyncadd [#allocation3], 4294967168 }
 0x1b1   :  { %167 = vsyncpa [#allocation3], 1 }

</bundles_post_ra>
